<compile_context>
chip_gen: v7x
topology: tpu7x:2x2x1
jax: 0.10.0
libtpu: 0.0.40
codegen_flags: <defaults>
</compile_context>

<pallas_src>
import math
import functools

import jax
import jax.numpy as jnp
from jax import lax
from jax.experimental import pallas as pl
from jax.experimental.pallas import tpu as pltpu


_NEG_INF = -1.0e30   # plain Python float -> becomes a literal, not a captured const


# -----------------------------------------------------------------------------
# Kernel 1: per (batch, kv_block) K/V projection + K RoPE, hoisted out of the
# attention kv loop.  Outputs are head-major (B, Hkv, S, Dh) bf16 so the
# attention kernel DMAs them directly with no per-step per-head repacking.
# -----------------------------------------------------------------------------
def _kv_project_kernel(x_ref, cos_ref, sin_ref, wk_ref, wv_ref,
                       k_out_ref, v_out_ref, *, n_kv_heads, head_dim):
  Hkv, Dh = n_kv_heads, head_dim
  Dhh = Dh // 2
  cdt = k_out_ref.dtype

  x = x_ref[0]                                                       # (tk, dim)
  k_pk = jnp.dot(x, wk_ref[...], preferred_element_type=jnp.float32)  # (tk, Hkv*Dh)
  v_pk = jnp.dot(x, wv_ref[...], preferred_element_type=jnp.float32)  # (tk, Hkv*Dh)

  # Wk columns are permuted host-side to [all heads' re | all heads' im].
  k_re, k_im = k_pk[:, :Hkv * Dhh], k_pk[:, Hkv * Dhh:]
  c, s = cos_ref[...], sin_ref[...]
  rot_re = k_re * c - k_im * s
  rot_im = k_re * s + k_im * c

  # Per-head writes happen once per kv block (amortized), not per kv step.
  for g in range(Hkv):
    k_out_ref[0, g, :, 0:Dhh] = rot_re[:, g * Dhh:(g + 1) * Dhh].astype(cdt)
    k_out_ref[0, g, :, Dhh:Dh] = rot_im[:, g * Dhh:(g + 1) * Dhh].astype(cdt)
    v_out_ref[0, g, :, :] = v_pk[:, g * Dh:(g + 1) * Dh].astype(cdt)


# -----------------------------------------------------------------------------
# Kernel 2: flash attention.  grid = (B, n_q_tiles, n_kv_steps); the kv axis is
# the reduction axis and only spans kv blocks intersecting the sliding window.
# -----------------------------------------------------------------------------
def _flash_attn_kernel(xq_ref, cosq_ref, sinq_ref, wq_ref, wo_ref, k_ref, v_ref,
                       out_ref, q_scr, m_scr, l_scr, acc_scr, o_scr,
                       *, n_heads, n_kv_heads, head_dim, tq, tk, window_size):
  H, Hkv, Dh = n_heads, n_kv_heads, head_dim
  Dhh = Dh // 2
  n_rep = H // Hkv
  cdt = q_scr.dtype

  q_idx = pl.program_id(1)
  kv_step = pl.program_id(2)
  q0 = q_idx * tq
  first_blk = jnp.maximum(q0 - (window_size - 1), 0) // tk
  kv_blk = first_blk + kv_step                     # un-clamped target kv block
  last_blk = (q0 + tq - 1) // tk                   # causal upper bound

  # ---- once per (batch, q tile): init state, project + rotate Q -------------
  @pl.when(kv_step == 0)
  def _init():
    m_scr[...] = jnp.full(m_scr.shape, _NEG_INF, m_scr.dtype)
    l_scr[...] = jnp.zeros(l_scr.shape, l_scr.dtype)
    acc_scr[...] = jnp.zeros(acc_scr.shape, acc_scr.dtype)

    xq = xq_ref[0]                                                   # (tq, dim)
    # Wq columns permuted to [all re | all im]; 1/sqrt(Dh) folded in host-side.
    q_pk = jnp.dot(xq, wq_ref[...], preferred_element_type=jnp.float32)
    q_re, q_im = q_pk[:, :H * Dhh], q_pk[:, H * Dhh:]
    c, s = cosq_ref[...], sinq_ref[...]
    rot_re = q_re * c - q_im * s
    rot_im = q_re * s + q_im * c
    # Regroup query heads by their shared kv head: rows [r*tq:(r+1)*tq] of
    # group g hold query head h = g * n_rep + r.
    for h in range(H):
      g, r = h // n_rep, h % n_rep
      q_scr[g, r * tq:(r + 1) * tq, 0:Dhh] = (
          rot_re[:, h * Dhh:(h + 1) * Dhh].astype(cdt))
      q_scr[g, r * tq:(r + 1) * tq, Dhh:Dh] = (
          rot_im[:, h * Dhh:(h + 1) * Dhh].astype(cdt))

  # ---- kv blocks intersecting the window: online-softmax update -------------
  @pl.when(kv_blk <= last_blk)
  def _update():
    k = k_ref[0]                              # (Hkv, tk, Dh) bf16, pre-rotated
    v = v_ref[0]                              # (Hkv, tk, Dh) bf16
    scores = jnp.einsum('gmd,gkd->gmk', q_scr[...], k,
                        preferred_element_type=jnp.float32)    # (Hkv, M, tk)

    def online_update(s, allowed=None):
      m_prev = m_scr[...]                                      # (Hkv, M)
      m_new = jnp.maximum(m_prev, jnp.max(s, axis=-1))
      alpha = jnp.exp(m_prev - m_new)
      p = jnp.exp(s - m_new[..., None])
      if allowed is not None:                 # explicit zero of masked entries
        p = jnp.where(allowed, p, 0.0)
      l_scr[...] = alpha * l_scr[...] + jnp.sum(p, axis=-1)
      acc_scr[...] = alpha[..., None] * acc_scr[...] + jnp.einsum(
          'gmk,gkd->gmd', p.astype(cdt), v, preferred_element_type=jnp.float32)
      m_scr[...] = m_new

    c0 = kv_blk * tk
    # Fast path: the whole block is causal and inside the window for every row.
    is_full = jnp.logical_and(c0 + tk - 1 <= q0,
                              c0 >= q0 + tq - window_size)

    @pl.when(is_full)
    def _full():
      online_update(scores)

    @pl.when(jnp.logical_not(is_full))
    def _masked():
      row = q0 + lax.broadcasted_iota(jnp.int32, (tq, tk), 0)
      col = c0 + lax.broadcasted_iota(jnp.int32, (tq, tk), 1)
      allowed = jnp.logical_and(col <= row, col > row - window_size)  # (tq, tk)
      allowed_m = jnp.tile(allowed, (n_rep, 1))[None, :, :]           # (1, M, tk)
      s_masked = jnp.where(allowed_m, scores, _NEG_INF)
      online_update(s_masked, allowed=allowed_m)

  # ---- last kv step: normalize, repack heads, fused Wo projection -----------
  @pl.when(kv_step == pl.num_programs(2) - 1)
  def _finalize():
    inv_l = pl.reciprocal(l_scr[...], approx=True)        # EUP, ~free
    o3 = acc_scr[...] * inv_l[..., None]                  # (Hkv, M, Dh) f32
    for h in range(H):
      g, r = h // n_rep, h % n_rep
      o_scr[:, h * Dh:(h + 1) * Dh] = o3[g, r * tq:(r + 1) * tq, :].astype(cdt)
    out_ref[0] = jnp.dot(o_scr[...], wo_ref[...],
                         preferred_element_type=jnp.float32).astype(out_ref.dtype)


# -----------------------------------------------------------------------------
# VMEM-budget / compiler-params helper.
# -----------------------------------------------------------------------------
def _padded_bytes(shape, dtype):
  dims = list(shape)
  if len(dims) >= 1:
    dims[-1] = -(-dims[-1] // 128) * 128
  if len(dims) >= 2:
    dims[-2] = -(-dims[-2] // 8) * 8
  n = 1
  for v in dims:
    n *= int(v)
  return n * jnp.dtype(dtype).itemsize


def _compiler_params(dimension_semantics, est_bytes):
  kwargs = dict(dimension_semantics=dimension_semantics)
  default_scoped = 16 * 1024 * 1024           # v5e default; v6e/v7x: 32 MiB
  if est_bytes > default_scoped:
    cap = 48 * 1024 * 1024                    # safe on v7x (64 MiB physical / TC)
    try:                                      # raise cap on 128-MiB generations
      if pltpu.get_tpu_info().vmem_capacity_bytes >= 100 * 1024 * 1024:
        cap = 100 * 1024 * 1024
    except Exception:
      pass
    kwargs["vmem_limit_bytes"] = int(
        min(max(est_bytes * 5 // 4, 32 * 1024 * 1024), cap))
  return pltpu.CompilerParams(**kwargs)


# -----------------------------------------------------------------------------
# Wrapper: host-side one-time weight/table prep + two pallas_calls.
# -----------------------------------------------------------------------------
def attention_forward(x, wq, wk, wv, wo, freqs_cos, freqs_sin, window_size,
                      n_heads, n_kv_heads, *, tq=128, tk=128,
                      compute_dtype=jnp.bfloat16):
  """x: (B, S, dim) f32.  Weights in PyTorch nn.Linear layout (out, in).
  For v6e/v7x, tk=256 (and tq=256 if VMEM allows) better fills the 256-wide MXU.
  """
  B, S, dim = x.shape
  assert dim % n_heads == 0 and n_heads % n_kv_heads == 0
  H, Hkv = n_heads, n_kv_heads
  Dh = dim // n_heads
  assert Dh % 2 == 0
  Dhh = Dh // 2
  n_rep = H // Hkv

  tq = min(tq, S)
  tk = min(tk, S)
  assert S % tq == 0 and S % tk == 0, "seq len must divide the tile sizes"
  n_q_tiles = S // tq
  n_kv_blocks = S // tk
  f32 = jnp.float32

  # Max number of kv blocks any q tile touches under the sliding window (static).
  n_kv_steps = 1
  for qb in range(n_q_tiles):
    q0 = qb * tq
    first = max(0, q0 - (window_size - 1)) // tk
    last = (q0 + tq - 1) // tk
    n_kv_steps = max(n_kv_steps, last - first + 1)

  # --- host-side (one-time) weight / table prep -------------------------------
  # Row permutation: per head, de-interleave (r0,i0,r1,i1,...) and group as
  # [all heads' real halves | all heads' imag halves].  Q and K use the same
  # permutation, so q.k^T is unchanged; V/Wo keep the original layout.
  d = jnp.arange(Dhh)

  def rope_rows(n_h):
    base = jnp.arange(n_h)[:, None] * Dh
    rows_re = (base + 2 * d[None, :]).reshape(-1)
    rows_im = (base + 2 * d[None, :] + 1).reshape(-1)
    return jnp.concatenate([rows_re, rows_im])

  q_scale = 1.0 / math.sqrt(Dh)           # folded into Wq (commutes with RoPE)
  wq_t = (jnp.transpose(wq[rope_rows(H), :]) * q_scale).astype(compute_dtype)
  wk_t = jnp.transpose(wk[rope_rows(Hkv), :]).astype(compute_dtype)
  wv_t = jnp.transpose(wv).astype(compute_dtype)
  wo_t = jnp.transpose(wo).astype(compute_dtype)

  cos_q = jnp.tile(freqs_cos.astype(f32), (1, H))        # (S, H*Dhh)
  sin_q = jnp.tile(freqs_sin.astype(f32), (1, H))
  cos_k = jnp.tile(freqs_cos.astype(f32), (1, Hkv))      # (S, Hkv*Dhh)
  sin_k = jnp.tile(freqs_sin.astype(f32), (1, Hkv))

  x_c = x.astype(compute_dtype)

  # --------------------- kernel 1: K/V projection + RoPE ----------------------
  est1 = 2 * (_padded_bytes((tk, dim), compute_dtype)
              + 2 * _padded_bytes((tk, Hkv * Dhh), f32)
              + 2 * _padded_bytes((Hkv, tk, Dh), compute_dtype))
  est1 += 2 * _padded_bytes((dim, Hkv * Dh), compute_dtype)     # Wk/Wv, 1-buffered
  est1 += 4 * _padded_bytes((tk, Hkv * Dh), f32)                # f32 temporaries

  kv_proj = functools.partial(_kv_project_kernel, n_kv_heads=Hkv, head_dim=Dh)
  k_rot, v_hm = pl.pallas_call(
      kv_proj,
      out_shape=(jax.ShapeDtypeStruct((B, Hkv, S, Dh), compute_dtype),
                 jax.ShapeDtypeStruct((B, Hkv, S, Dh), compute_dtype)),
      grid_spec=pltpu.PrefetchScalarGridSpec(
          num_scalar_prefetch=0,
          grid=(B, n_kv_blocks),
          in_specs=[
              pl.BlockSpec((1, tk, dim), lambda b, kb: (b, kb, 0)),
              pl.BlockSpec((tk, Hkv * Dhh), lambda b, kb: (kb, 0)),
              pl.BlockSpec((tk, Hkv * Dhh), lambda b, kb: (kb, 0)),
              pl.BlockSpec((dim, Hkv * Dh), lambda b, kb: (0, 0),
                           pipeline_mode=pl.Buffered(buffer_count=1)),
              pl.BlockSpec((dim, Hkv * Dh), lambda b, kb: (0, 0),
                           pipeline_mode=pl.Buffered(buffer_count=1)),
          ],
          out_specs=(
              pl.BlockSpec((1, Hkv, tk, Dh), lambda b, kb: (b, 0, kb, 0)),
              pl.BlockSpec((1, Hkv, tk, Dh), lambda b, kb: (b, 0, kb, 0)),
          ),
      ),
      compiler_params=_compiler_params(("parallel", "parallel"), est1),
  )(x_c, cos_k, sin_k, wk_t, wv_t)

  # ------------------------- kernel 2: flash attention ------------------------
  def kv_block_index(qb, ks):
    first = jnp.maximum(qb * tq - (window_size - 1), 0) // tk
    last = (qb * tq + tq - 1) // tk
    # Clamp to this tile's own last causal block: skipped steps repeat a block
    # index, so Pallas elides their DMAs entirely.
    return jnp.minimum(first + ks, last)

  def kv_map(b, qb, ks):
    return (b, 0, kv_block_index(qb, ks), 0)

  M = n_rep * tq
  est2 = 2 * (_padded_bytes((tq, dim), compute_dtype)
              + 2 * _padded_bytes((tq, H * Dhh), f32)
              + 2 * _padded_bytes((Hkv, tk, Dh), compute_dtype)
              + _padded_bytes((tq, dim), x.dtype))
  # single-buffered resident weights (TODO(synk): for very large dim on v7x,
  # tile Wq/Wo over head groups instead of holding them whole per core)
  est2 += _padded_bytes((dim, H * Dh), compute_dtype)
  est2 += _padded_bytes((H * Dh, dim), compute_dtype)
  # scratch
  est2 += _padded_bytes((Hkv, M, Dh), compute_dtype)            # q_scr
  est2 += 2 * _padded_bytes((Hkv, M), f32)                      # m/l
  est2 += _padded_bytes((Hkv, M, Dh), f32)                      # acc
  est2 += _padded_bytes((tq, H * Dh), compute_dtype)            # o_scr
  # in-kernel f32 temporaries (q_pk / rot_re / rot_im, scores / p / mask)
  est2 += 3 * _padded_bytes((tq, H * Dh), f32)
  est2 += 3 * _padded_bytes((Hkv, M, tk), f32)

  attn = functools.partial(_flash_attn_kernel, n_heads=H, n_kv_heads=Hkv,
                           head_dim=Dh, tq=tq, tk=tk, window_size=window_size)

  grid_spec = pltpu.PrefetchScalarGridSpec(
      num_scalar_prefetch=0,
      grid=(B, n_q_tiles, n_kv_steps),
      in_specs=[
          pl.BlockSpec((1, tq, dim), lambda b, qb, ks: (b, qb, 0)),    # x (q rows)
          pl.BlockSpec((tq, H * Dhh), lambda b, qb, ks: (qb, 0)),      # cos (q)
          pl.BlockSpec((tq, H * Dhh), lambda b, qb, ks: (qb, 0)),      # sin (q)
          pl.BlockSpec((dim, H * Dh), lambda b, qb, ks: (0, 0),        # Wq^T
                       pipeline_mode=pl.Buffered(buffer_count=1)),
          pl.BlockSpec((H * Dh, dim), lambda b, qb, ks: (0, 0),        # Wo^T
                       pipeline_mode=pl.Buffered(buffer_count=1)),
          pl.BlockSpec((1, Hkv, tk, Dh), kv_map),                      # rotated K
          pl.BlockSpec((1, Hkv, tk, Dh), kv_map),                      # V
      ],
      out_specs=pl.BlockSpec((1, tq, dim), lambda b, qb, ks: (b, qb, 0)),
      scratch_shapes=[
          pltpu.VMEM((Hkv, M, Dh), compute_dtype),   # Q regrouped by kv head
          pltpu.VMEM((Hkv, M), jnp.float32),         # running max
          pltpu.VMEM((Hkv, M), jnp.float32),         # running denom
          pltpu.VMEM((Hkv, M, Dh), jnp.float32),     # f32 accumulator
          pltpu.VMEM((tq, H * Dh), compute_dtype),   # packed head outputs
      ],
  )

  return pl.pallas_call(
      attn,
      out_shape=jax.ShapeDtypeStruct((B, S, dim), x.dtype),
      grid_spec=grid_spec,
      compiler_params=_compiler_params(("parallel", "parallel", "arbitrary"),
                                       est2),
  )(x_c, cos_q, sin_q, wq_t, wo_t, k_rot, v_hm)


# -----------------------------------------------------------------------------
# Pure-JAX reference (mirrors the PyTorch forward) for a correctness check.
# -----------------------------------------------------------------------------
def reference_forward(x, wq, wk, wv, wo, cos, sin, window_size,
                      n_heads, n_kv_heads):
  B, S, dim = x.shape
  head_dim = dim // n_heads
  n_rep = n_heads // n_kv_heads

  xq = (x @ wq.T).reshape(B, S, n_heads, head_dim)
  xk = (x @ wk.T).reshape(B, S, n_kv_heads, head_dim)
  xv = (x @ wv.T).reshape(B, S, n_kv_heads, head_dim)

  def rope(t):
    tr = t[..., 0::2]
    ti = t[..., 1::2]
    c = cos[None, :, None, :]
    s = sin[None, :, None, :]
    out_r = tr * c - ti * s
    out_i = tr * s + ti * c
    return jnp.stack([out_r, out_i], axis=-1).reshape(t.shape)

  xq = rope(xq)
  xk = rope(xk)
  xk = jnp.repeat(xk, n_rep, axis=2)
  xv = jnp.repeat(xv, n_rep, axis=2)

  xq = xq.transpose(0, 2, 1, 3)
  xk = xk.transpose(0, 2, 1, 3)
  xv = xv.transpose(0, 2, 1, 3)

  i = jnp.arange(S)[:, None]
  j = jnp.arange(S)[None, :]
  allowed = (j <= i) & (j >= i - window_size + 1)
  mask = jnp.where(allowed, 0.0, -jnp.inf).astype(jnp.float32)

  scores = xq @ xk.transpose(0, 1, 3, 2) / math.sqrt(head_dim)
  scores = scores + mask[None, None]
  p = jax.nn.softmax(scores, axis=-1)
  o = (p @ xv).transpose(0, 2, 1, 3).reshape(B, S, n_heads * head_dim)
  return o @ wo.T


if __name__ == "__main__":
  # Small config consistent with LTMConfig / Attention shapes.
  B, S = 2, 32
  dim = 64
  n_heads = 4
  n_kv_heads = 2
  head_dim = dim // n_heads          # 16
  window_size = 8

  key = jax.random.PRNGKey(0)
  kx, kq, kk, kv, ko = jax.random.split(key, 5)
  x = jax.random.normal(kx, (B, S, dim), dtype=jnp.float32)

  def init_w(k, out_f, in_f):
    bound = 1.0 / math.sqrt(in_f)
    return jax.random.uniform(k, (out_f, in_f), jnp.float32, -bound, bound)

  wq = init_w(kq, n_heads * head_dim, dim)
  wk = init_w(kk, n_kv_heads * head_dim, dim)
  wv = init_w(kv, n_kv_heads * head_dim, dim)
  wo = init_w(ko, dim, n_heads * head_dim)

  # Rotary frequency tables (llama-style), shape (S, head_dim // 2).
  inv_freq = 1.0 / (10000.0 ** (jnp.arange(0, head_dim, 2, dtype=jnp.float32)
                                / head_dim))
  t = jnp.arange(S, dtype=jnp.float32)
  freqs = jnp.outer(t, inv_freq)
  freqs_cos = jnp.cos(freqs)
  freqs_sin = jnp.sin(freqs)

  out = attention_forward(x, wq, wk, wv, wo, freqs_cos, freqs_sin,
                          window_size, n_heads, n_kv_heads,
                          tq=16, tk=16, compute_dtype=jnp.bfloat16)
  out = jax.block_until_ready(out)

  # Reference with bf16-rounded operands (kernel uses bf16 MXU operands with
  # f32 accumulation); tolerance sized for the remaining bf16 roundings and
  # the approx reciprocal in the softmax normalization.
  rnd = lambda a: a.astype(jnp.bfloat16).astype(jnp.float32)
  ref = reference_forward(rnd(x), rnd(wq), rnd(wk), rnd(wv), rnd(wo),
                          freqs_cos, freqs_sin, window_size,
                          n_heads, n_kv_heads)
  ref = jax.block_until_ready(ref)

  assert out.shape == (B, S, dim)
  assert bool(jnp.all(jnp.isfinite(out)))
  max_diff = float(jnp.max(jnp.abs(out - ref)))
  assert jnp.allclose(out, ref, rtol=3e-2, atol=3e-2), (
      f"max abs diff = {max_diff}")

  print("KERNEL_OK")
</pallas_src>

<mosaic_0001>
module attributes {stable_mosaic.version = 11 : i64} {
  func.func @_kv_project_kernel(%arg0: i32, %arg1: i32, %arg2: memref<1x16x64xbf16, #tpu.memory_space<vmem>>, %arg3: memref<16x16xf32, #tpu.memory_space<vmem>>, %arg4: memref<16x16xf32, #tpu.memory_space<vmem>>, %arg5: memref<64x32xbf16, #tpu.memory_space<vmem>>, %arg6: memref<64x32xbf16, #tpu.memory_space<vmem>>, %arg7: memref<1x2x16x16xbf16, #tpu.memory_space<vmem>>, %arg8: memref<1x2x16x16xbf16, #tpu.memory_space<vmem>>) attributes {dimension_semantics = [#tpu.dimension_semantics<parallel>, #tpu.dimension_semantics<parallel>], iteration_bounds = array<i64: 2, 2>, scalar_prefetch = 0 : i64, scratch_operands = 0 : i64, tpu.core_type = #tpu.core_type<tc>, window_params = [{transform_indices = @transform_0, window_bounds = array<i64: 1, 16, 64>}, {transform_indices = @transform_1, window_bounds = array<i64: 16, 16>}, {transform_indices = @transform_2, window_bounds = array<i64: 16, 16>}, {pipeline_mode = #tpu.pipeline_mode<synchronous>, transform_indices = @transform_3, window_bounds = array<i64: 64, 32>}, {pipeline_mode = #tpu.pipeline_mode<synchronous>, transform_indices = @transform_4, window_bounds = array<i64: 64, 32>}, {transform_indices = @transform_5, window_bounds = array<i64: 1, 2, 16, 16>}, {transform_indices = @transform_6, window_bounds = array<i64: 1, 2, 16, 16>}]} {
    %c0 = arith.constant 0 : index
    %c0_0 = arith.constant 0 : index
    %c0_1 = arith.constant 0 : index
    %0 = vector.load %arg2[%c0, %c0_0, %c0_1] : memref<1x16x64xbf16, #tpu.memory_space<vmem>>, vector<1x16x64xbf16>
    %1 = vector.shape_cast %0 : vector<1x16x64xbf16> to vector<16x64xbf16>
    %c0_2 = arith.constant 0 : index
    %c0_3 = arith.constant 0 : index
    %2 = vector.load %arg5[%c0_2, %c0_3] : memref<64x32xbf16, #tpu.memory_space<vmem>>, vector<64x32xbf16>
    %cst = arith.constant dense<0.000000e+00> : vector<16x32xf32>
    %3 = tpu.matmul %1, %2, %cst {dimension_numbers = #tpu.dot_dimension_numbers<[1], [0], [0], [1], [0, 0, 1, 1], [], []>} : vector<16x64xbf16>, vector<64x32xbf16>, vector<16x32xf32> -> vector<16x32xf32>
    %c0_4 = arith.constant 0 : index
    %c0_5 = arith.constant 0 : index
    %4 = vector.load %arg6[%c0_4, %c0_5] : memref<64x32xbf16, #tpu.memory_space<vmem>>, vector<64x32xbf16>
    %cst_6 = arith.constant dense<0.000000e+00> : vector<16x32xf32>
    %5 = tpu.matmul %1, %4, %cst_6 {dimension_numbers = #tpu.dot_dimension_numbers<[1], [0], [0], [1], [0, 0, 1, 1], [], []>} : vector<16x64xbf16>, vector<64x32xbf16>, vector<16x32xf32> -> vector<16x32xf32>
    %6 = vector.extract_strided_slice %3 {offsets = [0, 0], sizes = [16, 16], strides = [1, 1]} : vector<16x32xf32> to vector<16x16xf32>
    %7 = vector.extract_strided_slice %3 {offsets = [0, 16], sizes = [16, 16], strides = [1, 1]} : vector<16x32xf32> to vector<16x16xf32>
    %c0_7 = arith.constant 0 : index
    %c0_8 = arith.constant 0 : index
    %8 = vector.load %arg3[%c0_7, %c0_8] : memref<16x16xf32, #tpu.memory_space<vmem>>, vector<16x16xf32>
    %c0_9 = arith.constant 0 : index
    %c0_10 = arith.constant 0 : index
    %9 = vector.load %arg4[%c0_9, %c0_10] : memref<16x16xf32, #tpu.memory_space<vmem>>, vector<16x16xf32>
    %10 = arith.mulf %6, %8 : vector<16x16xf32>
    %11 = arith.mulf %7, %9 : vector<16x16xf32>
    %12 = arith.subf %10, %11 : vector<16x16xf32>
    %13 = arith.mulf %6, %9 : vector<16x16xf32>
    %14 = arith.mulf %7, %8 : vector<16x16xf32>
    %15 = arith.addf %13, %14 : vector<16x16xf32>
    %16 = vector.extract_strided_slice %12 {offsets = [0, 0], sizes = [16, 8], strides = [1, 1]} : vector<16x16xf32> to vector<16x8xf32>
    %17 = arith.truncf %16 : vector<16x8xf32> to vector<16x8xbf16>
    %c0_11 = arith.constant 0 : index
    %c0_12 = arith.constant 0 : index
    %c0_13 = arith.constant 0 : index
    %c0_14 = arith.constant 0 : index
    %18 = vector.load %arg7[%c0_11, %c0_12, %c0_13, %c0_14] : memref<1x2x16x16xbf16, #tpu.memory_space<vmem>>, vector<1x1x16x8xbf16>
    %19 = vector.shape_cast %18 : vector<1x1x16x8xbf16> to vector<16x8xbf16>
    %20 = vector.shape_cast %17 : vector<16x8xbf16> to vector<1x1x16x8xbf16>
    tpu.vector_store %arg7[%c0_11, %c0_12, %c0_13, %c0_14], %20 {strides = array<i32>} : memref<1x2x16x16xbf16, #tpu.memory_space<vmem>>, vector<1x1x16x8xbf16>,
    %21 = vector.extract_strided_slice %15 {offsets = [0, 0], sizes = [16, 8], strides = [1, 1]} : vector<16x16xf32> to vector<16x8xf32>
    %22 = arith.truncf %21 : vector<16x8xf32> to vector<16x8xbf16>
    %c0_15 = arith.constant 0 : index
    %c0_16 = arith.constant 0 : index
    %c0_17 = arith.constant 0 : index
    %c8 = arith.constant 8 : index
    %23 = vector.load %arg7[%c0_15, %c0_16, %c0_17, %c8] : memref<1x2x16x16xbf16, #tpu.memory_space<vmem>>, vector<1x1x16x8xbf16>
    %24 = vector.shape_cast %23 : vector<1x1x16x8xbf16> to vector<16x8xbf16>
    %25 = vector.shape_cast %22 : vector<16x8xbf16> to vector<1x1x16x8xbf16>
    tpu.vector_store %arg7[%c0_15, %c0_16, %c0_17, %c8], %25 {strides = array<i32>} : memref<1x2x16x16xbf16, #tpu.memory_space<vmem>>, vector<1x1x16x8xbf16>,
    %26 = vector.extract_strided_slice %5 {offsets = [0, 0], sizes = [16, 16], strides = [1, 1]} : vector<16x32xf32> to vector<16x16xf32>
    %27 = arith.truncf %26 : vector<16x16xf32> to vector<16x16xbf16>
    %c0_18 = arith.constant 0 : index
    %c0_19 = arith.constant 0 : index
    %c0_20 = arith.constant 0 : index
    %c0_21 = arith.constant 0 : index
    %28 = vector.load %arg8[%c0_18, %c0_19, %c0_20, %c0_21] : memref<1x2x16x16xbf16, #tpu.memory_space<vmem>>, vector<1x1x16x16xbf16>
    %29 = vector.shape_cast %28 : vector<1x1x16x16xbf16> to vector<16x16xbf16>
    %30 = vector.shape_cast %27 : vector<16x16xbf16> to vector<1x1x16x16xbf16>
    tpu.vector_store %arg8[%c0_18, %c0_19, %c0_20, %c0_21], %30 {strides = array<i32>} : memref<1x2x16x16xbf16, #tpu.memory_space<vmem>>, vector<1x1x16x16xbf16>,
    %31 = vector.extract_strided_slice %12 {offsets = [0, 8], sizes = [16, 8], strides = [1, 1]} : vector<16x16xf32> to vector<16x8xf32>
    %32 = arith.truncf %31 : vector<16x8xf32> to vector<16x8xbf16>
    %c0_22 = arith.constant 0 : index
    %c1 = arith.constant 1 : index
    %c0_23 = arith.constant 0 : index
    %c0_24 = arith.constant 0 : index
    %33 = vector.load %arg7[%c0_22, %c1, %c0_23, %c0_24] : memref<1x2x16x16xbf16, #tpu.memory_space<vmem>>, vector<1x1x16x8xbf16>
    %34 = vector.shape_cast %33 : vector<1x1x16x8xbf16> to vector<16x8xbf16>
    %35 = vector.shape_cast %32 : vector<16x8xbf16> to vector<1x1x16x8xbf16>
    tpu.vector_store %arg7[%c0_22, %c1, %c0_23, %c0_24], %35 {strides = array<i32>} : memref<1x2x16x16xbf16, #tpu.memory_space<vmem>>, vector<1x1x16x8xbf16>,
    %36 = vector.extract_strided_slice %15 {offsets = [0, 8], sizes = [16, 8], strides = [1, 1]} : vector<16x16xf32> to vector<16x8xf32>
    %37 = arith.truncf %36 : vector<16x8xf32> to vector<16x8xbf16>
    %c0_25 = arith.constant 0 : index
    %c1_26 = arith.constant 1 : index
    %c0_27 = arith.constant 0 : index
    %c8_28 = arith.constant 8 : index
    %38 = vector.load %arg7[%c0_25, %c1_26, %c0_27, %c8_28] : memref<1x2x16x16xbf16, #tpu.memory_space<vmem>>, vector<1x1x16x8xbf16>
    %39 = vector.shape_cast %38 : vector<1x1x16x8xbf16> to vector<16x8xbf16>
    %40 = vector.shape_cast %37 : vector<16x8xbf16> to vector<1x1x16x8xbf16>
    tpu.vector_store %arg7[%c0_25, %c1_26, %c0_27, %c8_28], %40 {strides = array<i32>} : memref<1x2x16x16xbf16, #tpu.memory_space<vmem>>, vector<1x1x16x8xbf16>,
    %41 = vector.extract_strided_slice %5 {offsets = [0, 16], sizes = [16, 16], strides = [1, 1]} : vector<16x32xf32> to vector<16x16xf32>
    %42 = arith.truncf %41 : vector<16x16xf32> to vector<16x16xbf16>
    %c0_29 = arith.constant 0 : index
    %c1_30 = arith.constant 1 : index
    %c0_31 = arith.constant 0 : index
    %c0_32 = arith.constant 0 : index
    %43 = vector.load %arg8[%c0_29, %c1_30, %c0_31, %c0_32] : memref<1x2x16x16xbf16, #tpu.memory_space<vmem>>, vector<1x1x16x16xbf16>
    %44 = vector.shape_cast %43 : vector<1x1x16x16xbf16> to vector<16x16xbf16>
    %45 = vector.shape_cast %42 : vector<16x16xbf16> to vector<1x1x16x16xbf16>
    tpu.vector_store %arg8[%c0_29, %c1_30, %c0_31, %c0_32], %45 {strides = array<i32>} : memref<1x2x16x16xbf16, #tpu.memory_space<vmem>>, vector<1x1x16x16xbf16>,
    return
  }
  func.func @transform_0(%arg0: i32, %arg1: i32) -> (i32, i32, i32) {
    %c0_i32 = arith.constant 0 : i32
    %c0_i32_0 = arith.constant 0 : i32
    return %arg0, %arg1, %c0_i32 : i32, i32, i32
  }
  func.func @transform_1(%arg0: i32, %arg1: i32) -> (i32, i32) {
    %c0_i32 = arith.constant 0 : i32
    %c0_i32_0 = arith.constant 0 : i32
    return %arg1, %c0_i32 : i32, i32
  }
  func.func @transform_2(%arg0: i32, %arg1: i32) -> (i32, i32) {
    %c0_i32 = arith.constant 0 : i32
    %c0_i32_0 = arith.constant 0 : i32
    return %arg1, %c0_i32 : i32, i32
  }
  func.func @transform_3(%arg0: i32, %arg1: i32) -> (i32, i32) {
    %c0_i32 = arith.constant 0 : i32
    %c0_i32_0 = arith.constant 0 : i32
    %c0_i32_1 = arith.constant 0 : i32
    return %c0_i32, %c0_i32_0 : i32, i32
  }
  func.func @transform_4(%arg0: i32, %arg1: i32) -> (i32, i32) {
    %c0_i32 = arith.constant 0 : i32
    %c0_i32_0 = arith.constant 0 : i32
    %c0_i32_1 = arith.constant 0 : i32
    return %c0_i32, %c0_i32_0 : i32, i32
  }
  func.func @transform_5(%arg0: i32, %arg1: i32) -> (i32, i32, i32, i32) {
    %c0_i32 = arith.constant 0 : i32
    %c0_i32_0 = arith.constant 0 : i32
    %c0_i32_1 = arith.constant 0 : i32
    return %arg0, %c0_i32, %arg1, %c0_i32_0 : i32, i32, i32, i32
  }
  func.func @transform_6(%arg0: i32, %arg1: i32) -> (i32, i32, i32, i32) {
    %c0_i32 = arith.constant 0 : i32
    %c0_i32_0 = arith.constant 0 : i32
    %c0_i32_1 = arith.constant 0 : i32
    return %arg0, %c0_i32, %arg1, %c0_i32_0 : i32, i32, i32, i32
  }
}

</mosaic_0001>

<bundles_post_ra>
// kernel: tpu_custom_call.1
= control target key start
LH: loop header
LB: loop body
LE: loop exit
PB: predicated region body
PF: predicated region fallthrough
CT: control target
= control target key end

     0   :  { %s1103_s21 = smov 0   ;;  %s1105_s22 = smov 0   ;;  %s1272_s0 = inlined_call_operand.vmem [shape: bf16[2,32,64], index: 0, kind: input, shape index: {}]   ;;  %s1273_s1 = inlined_call_operand.vmem [shape: f32[32,16], index: 1, kind: input, shape index: {}]   ;;  %s1274_s2 = inlined_call_operand.vmem [shape: f32[32,16], index: 2, kind: input, shape index: {}]   ;;  %s1275_s3 = inlined_call_operand.vmem [shape: bf16[64,32], index: 3, kind: input, shape index: {}]   ;;  %s1276_s4 = inlined_call_operand.vmem [shape: bf16[64,32], index: 4, kind: input, shape index: {}]   ;;  %s1277_s5 = inlined_call_operand.vmem [shape: bf16[2,2,32,16], index: 5, kind: output, shape index: {0}]   ;;  %s1278_s6 = inlined_call_operand.vmem [shape: bf16[2,2,32,16], index: 6, kind: output, shape index: {1}]  }
   0x1   :  { %s1107_s23 = smov 0   ;;  %s1109_s24 = smov 0  }
   0x2   :  { %s1111_s25 = smov 0   ;;  %s1113_s26 = smov 0  }
   0x3   :  { %s1115_s27 = smov 0  }
   0x4 LB: > { %s26_s28 = sadd.s32 1, %s1052_s25  ;;  %s29_s29 = sadd.s32 1, %s1056_s26  ;;  %s1060_s27 = sphi %s1115_s27, %s17_s27   ;;  %s1056_s26 = sphi %s1113_s26, %s1291_s26   ;;  %s1052_s25 = sphi %s1111_s25, %s1290_s25   ;;  %s1048_s24 = sphi %s1109_s24, %s1289_s24   ;;  %s1044_s23 = sphi %s1107_s23, %s1288_s23   ;;  %s1040_s22 = sphi %s1105_s22, %s1287_s22   ;;  %s1036_s21 = sphi %s1103_s21, %s1286_s21  }
   0x5   : > { %p27_p0 = scmp.ge.s32.totalorder %s26_s28, 2  ;;  %s848_s30 = sadd.s32 4294967295, %s1060_s27  }
   0x6   : > { %p170_p1 = scmp.ne.s32.totalorder %s1040_s22, %s1036_s21  ;;  %p171_p2 = scmp.eq.s32.totalorder %s848_s30, 3 }
   0x7   : > { %s1293_s28 = smov (%p27_p0, %s26_s28), 0  ;;  %s1295_s29 = smov (!%p27_p0, %s29_s29), %s1056_s26 }
   0x8   : > { %1281 = sst [smem:[#allocation4_spill]] %s1293_s28  ;;  %s156_s7 = ssub.s32 %s1052_s25, %s1293_s28 }
   0x9   : > { %p31_p3 = scmp.ge.s32.totalorder %s1295_s29, 2  ;;  %p852_p4 = scmp.ge.s32.totalorder %s1060_s27, 1 }
   0xa   : > { %p1149_p5 = por %p171_p2, %p170_p1  ;;  %p260_p6 = scmp.lt.s32.totalorder %s1060_s27, 5 }
   0xb   : > { %s1297_s29 = smov (%p31_p3, %s1295_s29), 0  ;;  %s160_s11 = sadd.s32 1, %s1040_s22 }
   0xc   : > { %1283 = sst [smem:[#allocation5_spill]] %s1297_s29  ;;  %p261_p7 = pnand %p852_p4, %p260_p6 }
   0xd   : > { %s155_s9 = ssub.s32 %s1056_s26, %s1297_s29  ;;  %v997_v0 = vld [vmem:[%s1275_s3] sm:$0xff] (!%p261_p7)   ;;  %v1062_v1 = vmov (!%p261_p7), 0.0   ;;  %v998_v2 = vld [vmem:[%s1275_s3 + $0x8] sm:$0xff] (!%p261_p7)   ;;  %vm1063_vm0 = vmmov (!%p261_p7), 0   ;;  %s1169_s17 = sshll.u32 (!%p261_p7), %s1044_s23, 1  ;;  %v999_v4 = vld [vmem:[%s1275_s3 + $0x10] sm:$0xff] (!%p261_p7)  }
   0xe   : > { %s157_s10 = sor.u32 %s156_s7, %s155_s9  ;;  %264 = sbr.rel (%p261_p7) target bundleno = 501 (0x1f5), region = 40  ;;  %911 = vmatprep.subr.bf16.mxu0 (!%p261_p7), %v1062_v1  ;;  %923 = vmatprep.subr.bf16.mxu1 (!%p261_p7), %v1062_v1  ;;  %v1002_v3 = vld [vmem:[%s1276_s4] sm:$0xff] (!%p261_p7)   ;;  %v1003_v5 = vld [vmem:[%s1276_s4 + $0x8] sm:$0xff] (!%p261_p7)   ;;  %v1000_v6 = vld [vmem:[%s1275_s3 + $0x18] sm:$0xff] (!%p261_p7)   ;;  %vm371_vm1 = vcmask (!%p261_p7), 523264   ;;  %vm571_vm2 = vcmask (!%p261_p7), 125952  }
   0xf   : > { %p158_p8 = scmp.eq.s32.totalorder %s157_s10, 0  ;;  %912 = vmatpush3.bf16.msra.mxu0 (!%p261_p7), %v997_v0  ;;  %919 = vmatprep.mubr.msk.bf16.mxu0 (!%p261_p7), %vm1063_vm0, %v1062_v1  ;;  %p308_p9 = scmp.lt.s32.totalorder (!%p261_p7), %s1048_s24, 1  ;;  %v1004_v8 = vld [vmem:[%s1276_s4 + $0x10] sm:$0xff] (!%p261_p7)   ;;  %v1005_v13 = vld [vmem:[%s1276_s4 + $0x18] sm:$0xff] (!%p261_p7)   ;;  %vm545_vm3 = vcmask (!%p261_p7), 60416   ;;  %vm560_vm4 = vcmask (!%p261_p7), 126016  }
  0x10   : > { %913 = vmatprep.subr.bf16.mxu0 (!%p261_p7), %v1062_v1  ;;  %931 = vmatprep.mubr.msk.bf16.mxu1 (!%p261_p7), %vm1063_vm0, %v1062_v1  ;;  %p310_p10 = scmp.lt.s32.totalorder (!%p261_p7), %s1169_s17, 3  ;;  %s1064_s16 = smov (!%p261_p7), 16  }
  0x11   : > { %s1160_s12 = scalar_select %p158_p8, %s1040_s22, %s160_s11  }
  0x12   : > { %924 = vmatpush3.bf16.msra.mxu1 (!%p261_p7), %v1002_v3  ;;  %s1066_s20 = smov (!%p261_p7), 120   ;;  %s1067_s30 = smov (!%p261_p7), 8  }
  0x13   : > { %914 = vmatpush3.bf16.msra.mxu0 (!%p261_p7), %v998_v2  ;;  %925 = vmatprep.subr.bf16.mxu1 (!%p261_p7), %v1062_v1 }
  0x14   : > { %915 = vmatprep.subr.bf16.mxu0 (!%p261_p7), %v1062_v1 }
  0x15   : > { %s309_s7 = scalar_select %p308_p9, %s1048_s24, 1 }
  0x16   : > { %s311_s9 = scalar_select %p310_p10, %s1169_s17, 3  ;;  %926 = vmatpush3.bf16.msra.mxu1 %v1003_v5 }
  0x17   : > { %s856_s11 = sshll.u32 %s309_s7, 2  ;;  %916 = vmatpush3.bf16.msra.mxu0 %v999_v4  ;;  %927 = vmatprep.subr.bf16.mxu1 %v1062_v1 }
  0x18   : > { %s313_s13 = sadd.s32 %s856_s11, %s311_s9  ;;  %s859_s14 = sshll.u32 %s311_s9, 3  ;;  %917 = vmatprep.subr.bf16.mxu0 %v1062_v1 }
  0x19   : > { %s857_s15 = sshll.u32 %s313_s13, 2  ;;  %s327_s19 = scalar_lea.vmem %s1274_s2, %s859_s14 }
  0x1a   : > { %s315_s23 = scalar_lea.vmem %s1272_s0, %s857_s15  ;;  %v491_v7 = vld [vmem:[%s327_s19] sm:$0xff]  ;;  %s321_s11 = scalar_lea.vmem %s1273_s1, %s859_s14  ;;  %v492_v10 = vld [vmem:[%s327_s19 + $0x8] sm:$0xff]  ;;  %928 = vmatpush3.bf16.msra.mxu1 %v1004_v8 }
  0x1b   : > { %497 = vrot.lane.b32.xlu0 %v491_v7, %s1064_s16  ;;  %v489_v9 = vld [vmem:[%s321_s11] sm:$0xff]  ;;  %918 = vmatpush3.bf16.msra.mxu0 %v1000_v6  ;;  %v490_v12 = vld [vmem:[%s321_s11 + $0x8] sm:$0xff]  ;;  %s298_s14 = sand.u32 1, %s1036_s21   ;;  %s1065_s15 = smov 112  }
  0x1c   : > { %v1001_v11 = vld [vmem:[%s315_s23] sm:$0xff]   ;;  %519 = vrot.lane.b32.xlu1 %v489_v9, %s1064_s16  ;;  %929 = vmatprep.subr.bf16.mxu1 %v1062_v1  ;;  %s853_s18 = sshll.u32 %s298_s14, 4  ;;  %s888_s23 = sshll.u32 (%p1149_p5), %s1048_s24, 3 }
  0x1d   : > { %s1206_s21 = scalar_lea.vmem [#allocation3], %s853_s18  ;;  %s1213_s19 = scalar_lea.vmem [#allocation2], %s853_s18 }
  0x1e   : > { %920 = vmatmul.mubr.msk.bf16.vlgmr.msra.gmra.mrb[0].mxu0 %vm371_vm1, %v1001_v11  ;;  %930 = vmatpush3.bf16.msra.mxu1 %v1005_v13  ;;  %s609_s10 = sadd.s32 (%p1149_p5), %s888_s23, %s1169_s17 }
  0x1f   : > { %499 = vrot.lane.b32.xlu0 %v492_v10, %s1064_s16  ;;  %s889_s7 = sshll.u32 (%p1149_p5), %s609_s10, 2 }
  0x20   : > { %521 = vrot.lane.b32.xlu1 %v490_v12, %s1064_s16  ;;  %s611_s13 = scalar_lea.vmem (%p1149_p5), %s1277_s5, %s889_s7 }
  0x21   : > { %932 = vmatmul.mubr.msk.bf16.vlgmr.msra.gmra.mrb[0].mxu1 %vm371_vm1, %v1001_v11 }
  0x8d   : > { %v498_v14 = vpop.permute.xlu0 %497 }
  0x8e   : > { %v520_v15 = vpop.permute.xlu1 %519 }
  0x91   : > { %v500_v17 = vpop.permute.xlu0 %499 }
  0x92   : > { %v522_v23 = vpop.permute.xlu1 %521 }
  0xf1   : > { %v409_v16 = vpop.f32.mrb[0].mxu0 }
  0xf2   : > { %v921_v18 = vpop.f32.mrb[1].mxu0  ;;  %v503_v19 = vmul.f32 %v498_v14, %v409_v16  ;;  %v525_v25 = vmul.f32 %v520_v15, %v409_v16  ;;  %v493_v32 = vmul.f32 %v489_v9, %v409_v16  ;;  %v515_v39 = vmul.f32 %v491_v7, %v409_v16 }
  0xf3   : > { %v412_v20 = vpop.f32.mrb[2].mxu0 }
  0xf4   : > { %507 = vrot.lane.b32.xlu0 %v503_v19, %s1065_s15  ;;  %v922_v21 = vpop.f32.mrb[3].mxu0  ;;  %v504_v22 = vmul.f32 %v500_v17, %v412_v20  ;;  %v482_v24 = vpop.f32.mrb[0].mxu1  ;;  %v526_v29 = vmul.f32 %v522_v23, %v412_v20  ;;  %v494_v35 = vmul.f32 %v490_v12, %v412_v20  ;;  %v516_v43 = vmul.f32 %v492_v10, %v412_v20 }
  0xf5   : > { %v899_v26 = vpack.c.bf16 %v482_v24, %v482_v24  ;;  %v933_v27 = vpop.f32.mrb[1].mxu1 }
  0xf6   : > { %509 = vrot.lane.b32.xlu1 %v504_v22, %s1065_s15  ;;  %v485_v28 = vpop.f32.mrb[2].mxu1 }
  0xf7   : > { %572 = vst.msk [vmem:[%s1206_s21] sm:$0xf] %vm571_vm2, %v899_v26  ;;  %v900_v30 = vpack.c.bf16 %v485_v28, %v485_v28  ;;  %v934_v31 = vpop.f32.mrb[3].mxu1 }
  0xf8   : > { %529 = vrot.lane.b32.xlu0 %v525_v25, %s1065_s15 }
  0xf9   : > { %573 = vst.msk [vmem:[%s1206_s21 + $0x4] sm:$0xf] %vm571_vm2, %v900_v30 }
  0xfa   : > { %531 = vrot.lane.b32.xlu1 %v526_v29, %s1065_s15 }
 0x166   : > { %v508_v33 = vpop.permute.xlu0 %507 }
 0x167   : > { %v513_v34 = vsub.f32 %v493_v32, %v508_v33 }
 0x168   : > { %v510_v36 = vpop.permute.xlu1 %509 }
 0x169   : > { %v895_v37 = vpack.c.bf16 %v513_v34, %v513_v34  ;;  %v514_v38 = vsub.f32 %v494_v35, %v510_v36 }
 0x16a   : > { %v530_v40 = vpop.permute.xlu0 %529 }
 0x16b   : > { %546 = vst.msk [vmem:[%s1213_s19] sm:$0xf] %vm545_vm3, %v895_v37  ;;  %v896_v41 = vpack.c.bf16 %v514_v38, %v514_v38  ;;  %v535_v42 = vadd.f32 %v530_v40, %v515_v39  ;;  %574 = vrot.lane.b32.xlu0 %v895_v37, %s1066_s20 }
 0x16c   : > { %v532_v44 = vpop.permute.xlu1 %531 }
 0x16d   : > { %547 = vst.msk [vmem:[%s1213_s19 + $0x4] sm:$0xf] %vm545_vm3, %v896_v41  ;;  %v897_v45 = vpack.c.bf16 %v535_v42, %v535_v42  ;;  %v536_v46 = vadd.f32 %v532_v44, %v516_v43  ;;  %576 = vrot.lane.b32.xlu1 %v896_v41, %s1066_s20 }
 0x16f   : > { %v898_v47 = vpack.c.bf16 %v536_v46, %v536_v46  ;;  %554 = vrot.lane.b32.xlu0 %v897_v45, %s1067_s30 }
 0x171   : > { %556 = vrot.lane.b32.xlu1 %v898_v47, %s1067_s30 }
 0x173   : > { %587 = vrot.lane.b32.xlu0 %v899_v26, %s1065_s15 }
 0x175   : > { %589 = vrot.lane.b32.xlu1 %v900_v30, %s1065_s15 }
 0x1dd   : > { %v575_v48 = vpop.permute.xlu0 %574 }
 0x1de   : > { %879 = vst.msk [vmem:[%s1213_s19 + $0x8] sm:$0xf] %vm545_vm3, %v575_v48 }
 0x1df   : > { %881 = vst.msk [vmem:[%s1213_s19 + $0x8] sm:$0xf] %vm560_vm4, %v897_v45  ;;  %v577_v49 = vpop.permute.xlu1 %576 }
 0x1e0   : > { %880 = vst.msk [vmem:[%s1213_s19 + $0xc] sm:$0xf] %vm545_vm3, %v577_v49 }
 0x1e1   : > { %882 = vst.msk [vmem:[%s1213_s19 + $0xc] sm:$0xf] %vm560_vm4, %v898_v47  ;;  %v555_v50 = vpop.permute.xlu0 %554 }
 0x1e2   : > { %561 = vst.msk [vmem:[%s1213_s19] sm:$0xf] %vm560_vm4, %v555_v50  ;;  %606 = sbr.rel (!%p1149_p5) target bundleno = 493 (0x1ed), region = 44 }
 0x1e3   : > { %v557_v51 = vpop.permute.xlu1 %556 }
 0x1e4   : > { %562 = vst.msk [vmem:[%s1213_s19 + $0x4] sm:$0xf] %vm560_vm4, %v557_v51 }
 0x1e5   : > { %v588_v52 = vpop.permute.xlu0 %587 }
 0x1e6   : > { %883 = vst.msk [vmem:[%s1206_s21 + $0x8] sm:$0xf] %vm571_vm2, %v588_v52 }
 0x1e7   : > { %v590_v53 = vpop.permute.xlu1 %589 }
 0x1e8   : > { %884 = vst.msk [vmem:[%s1206_s21 + $0xc] sm:$0xf] %vm571_vm2, %v590_v53  ;;  %v631_v55 = vld [vmem:[%s1213_s19 + $0x8] sm:$0xff] (%p1149_p5)  }
 0x1e9   : > { %632 = vst [vmem:[%s611_s13 + $0x10] sm:$0xff] %v631_v55  }
 0x1eb   : > { %v627_v54 = vld [vmem:[%s1213_s19] sm:$0xff]  }
 0x1ec   : > { %628 = vst [vmem:[%s611_s13] sm:$0xff] %v627_v54  }
 0x1ed PF: > { %665 = sbr.rel (!%p1149_p5) target bundleno = 501 (0x1f5), region = 85  ;;  %s891_s16 = sshll.u32 (%p1149_p5), %s1048_s24, 3  ;;  %v686_v56 = vld [vmem:[%s1206_s21] sm:$0xff] (%p1149_p5)  }
 0x1ee   : > { %s668_s28 = sadd.s32 (%p1149_p5), %s891_s16, %s1169_s17 }
 0x1ef   : > { %s892_s29 = sshll.u32 (%p1149_p5), %s668_s28, 2 }
 0x1f0   : > { %s670_s18 = scalar_lea.vmem (%p1149_p5), %s1278_s6, %s892_s29 }
 0x1f1   : > { %687 = vst [vmem:[%s670_s18] sm:$0xff] (%p1149_p5), %v686_v56  }
 0x1f3   : > { %v690_v57 = vld [vmem:[%s1206_s21 + $0x8] sm:$0xff] (%p1149_p5)  }
 0x1f4   : > { %691 = vst [vmem:[%s670_s18 + $0x10] sm:$0xff] %v690_v57  }
 0x1f5 PF: > { %s17_s27 = sadd.s32 1, %s1060_s27   ;;  %s1284_s8 = sld [smem:[#allocation4_spill]] }
 0x1f6   : > { %p14_p11 = scmp.ge.s32.totalorder %s17_s27, 6   ;;  %s1285_s17 = sld [smem:[#allocation5_spill]] }
 0x1f7   : > { %s1286_s21 = smov %s1040_s22  ;;  %s1287_s22 = smov %s1160_s12 }
 0x1f8   : > { %s1288_s23 = smov %s1052_s25  ;;  %s1289_s24 = smov %s1056_s26 }
 0x1f9   :  { %16 = sbr.rel (!%p14_p11) target bundleno = 4 (0x4), region = 172 }
 0x1fb   : > { %s1290_s25 = smov %s1284_s8 }
 0x1fc   : > { %s1291_s26 = smov %s1285_s17 }

</bundles_post_ra>
